<compile_context>
chip_gen: v7x
topology: tpu7x:2x2x1
jax: 0.10.0
libtpu: 0.0.40
codegen_flags: <defaults>
</compile_context>

<pallas_src>
import functools

import jax
import jax.numpy as jnp
from jax.experimental import pallas as pl
from jax.experimental.pallas import tpu as pltpu


def _round_up(v, m):
    return ((v + m - 1) // m) * m


# ---------------------------------------------------------------------------
# Kernel
# ---------------------------------------------------------------------------
def _random_context_kernel(x_ref, wt_ref, b_ref, beta_ref, o_ref, *scratch,
                           grid_k, tile_k, tile_n, inp_dim, ones_col,
                           col_axis, mask_k_tail):
    """One (row-tile, col-tile) output block; K (inp_dim) reduced over grid axis 2."""
    k = pl.program_id(2)

    xb = x_ref[...]
    if mask_k_tail:
        # Zero the K padding of the last K tile.  wt_pad's padded K rows are
        # real zeros, so the product contributes exactly 0 (never NaN).
        kcol = jax.lax.broadcasted_iota(jnp.int32, xb.shape, 1) + k * tile_k
        xb = jnp.where(kcol < inp_dim, xb, 0.0)

    part = jnp.dot(xb, wt_ref[...], preferred_element_type=jnp.float32)

    def _finish(y):
        y = y + b_ref[...]                                   # [1, tile_n] broadcast
        gate = y >= beta_ref[...]
        # Force the fused "ones" column to literal 1.0 (robust to NaN/Inf rows).
        ocol = (jax.lax.broadcasted_iota(jnp.int32, gate.shape, 1)
                + pl.program_id(col_axis) * tile_n)
        gate = jnp.logical_or(gate, ocol == ones_col)
        o_ref[...] = gate.astype(o_ref.dtype)

    if grid_k == 1:
        _finish(part)
    else:
        acc_ref = scratch[0]

        @pl.when(k == 0)
        def _():
            acc_ref[...] = jnp.zeros_like(acc_ref)

        acc_ref[...] += part

        @pl.when(k == grid_k - 1)
        def _():
            _finish(acc_ref[...])


# ---------------------------------------------------------------------------
# One-time parameter packing (outside the hot path)
# ---------------------------------------------------------------------------
_K_RESIDENT_MAX = 2048   # keep the whole K dimension resident up to this inp_dim
_K_TILE = 1024           # K tile when inp_dim is larger (bounds VMEM, esp. v7x)


def prepare_random_context_params(w, b, beta):
    """Pack W^T / bias / beta once.

    w:    [outp_dim, inp_dim]  -> zero-padded W^T  [k_pad, out_cols]
    b:    [outp_dim]           -> [1, out_cols] (0 in padded cols)
    beta: [outp_dim]           -> [1, out_cols]; col outp_dim = -1 (ones column),
                                  padded cols = +1 (gate 0, never stored anyway)
    out_cols = round_up(outp_dim + 1, 128) keeps parameter DMAs lane-aligned;
    the OUTPUT itself is exactly outp_dim + 1 wide (no wrapper slice needed).
    """
    w = jnp.asarray(w, jnp.float32)
    b = jnp.asarray(b, jnp.float32)
    beta = jnp.asarray(beta, jnp.float32)
    outp_dim, inp_dim = w.shape

    out_cols = _round_up(outp_dim + 1, 128)
    tile_n = min(512, out_cols)
    grid_n = pl.cdiv(outp_dim + 1, tile_n)          # masked tail handled by Pallas

    if inp_dim <= _K_RESIDENT_MAX:
        tile_k, grid_k, k_pad = inp_dim, 1, inp_dim
    else:
        tile_k = _K_TILE
        grid_k = pl.cdiv(inp_dim, tile_k)
        k_pad = grid_k * tile_k                     # zero rows -> clean K tail

    wt_pad = jnp.zeros((k_pad, out_cols), jnp.float32)
    wt_pad = wt_pad.at[:inp_dim, :outp_dim].set(w.T)

    b_pad = jnp.zeros((1, out_cols), jnp.float32)
    b_pad = b_pad.at[0, :outp_dim].set(b)

    beta_pad = jnp.full((1, out_cols), 1.0, jnp.float32)    # padded cols -> gate 0
    beta_pad = beta_pad.at[0, :outp_dim].set(beta)
    beta_pad = beta_pad.at[0, outp_dim].set(-1.0)           # ones column -> gate 1

    return dict(wt=wt_pad, b=b_pad, beta=beta_pad,
                inp_dim=inp_dim, outp_dim=outp_dim, out_cols=out_cols,
                tile_k=tile_k, grid_k=grid_k, k_pad=k_pad,
                tile_n=tile_n, grid_n=grid_n)


# ---------------------------------------------------------------------------
# Forward
# ---------------------------------------------------------------------------
_TILE_VMEM_BUDGET = 24 << 20    # per-step working-set target (safe on v5e/v6e/v7x)
_VMEM_LIMIT_BYTES = 40 << 20    # explicit scoped-VMEM limit; headroom under v7x 64 MiB


def random_context_forward(x, params, out_dtype=jnp.float32):
    """x: [N, inp_dim] f32; params from prepare_random_context_params.

    Returns [N, outp_dim + 1] in `out_dtype` (last column is ones), matching the
    PyTorch module's forward.  `out_dtype=jnp.bfloat16` (0/1 exact) halves the
    HBM store traffic if the caller tolerates a non-f32 result dtype.
    """
    x = jnp.asarray(x, jnp.float32)
    n, inp_dim = x.shape
    assert inp_dim == params["inp_dim"]

    wt_pad, b_pad, beta_pad = params["wt"], params["b"], params["beta"]
    outp_dim, out_cols = params["outp_dim"], params["out_cols"]
    tile_k, grid_k, k_pad = params["tile_k"], params["grid_k"], params["k_pad"]
    tile_n, grid_n = params["tile_n"], params["grid_n"]

    out_bytes = jnp.dtype(out_dtype).itemsize
    sub = max(8, 32 // out_bytes)               # min sublane multiple for out dtype

    # --- row tile derived from the VMEM budget --------------------------------
    # double-buffered x + out, double-buffered W^T tile, bias/beta, accumulator
    fixed = 2 * tile_k * tile_n * 4 + 4 * tile_n * 4
    per_row = (2 * tile_k * 4 + 2 * tile_n * out_bytes
               + (tile_n * 4 if grid_k > 1 else 0))
    cap_rows = max(sub, ((_TILE_VMEM_BUDGET - fixed) // per_row) // sub * sub)
    tile_m = min(512, cap_rows, _round_up(n, sub))
    grid_m = pl.cdiv(n, tile_m)

    # v7x megacore: never leave a (1, 1) parallel grid for mid-size batches.
    if grid_m == 1 and grid_n == 1 and n > 64:
        tile_m = _round_up(pl.cdiv(n, 2), sub)
        grid_m = pl.cdiv(n, tile_m)

    # --- grid ordering: keep the larger operand fetched exactly once ----------
    if grid_k == 1:
        weight_outer = (grid_n - 1) * n * inp_dim <= (grid_m - 1) * k_pad * out_cols
    else:
        weight_outer = False

    if weight_outer:
        # Column tiles outermost -> W^T block index constant across inner rows
        # (Pallas skips the re-DMA), weight read from HBM exactly once.
        grid = (grid_n, grid_m, grid_k)
        x_spec = pl.BlockSpec((tile_m, tile_k), lambda j, i, k: (i, k))
        wt_spec = pl.BlockSpec((tile_k, tile_n), lambda j, i, k: (k, j))
        b_spec = pl.BlockSpec((1, tile_n), lambda j, i, k: (0, j))
        beta_spec = pl.BlockSpec((1, tile_n), lambda j, i, k: (0, j))
        out_spec = pl.BlockSpec((tile_m, tile_n), lambda j, i, k: (i, j))
        col_axis = 0
    else:
        # Row tiles outermost -> x read from HBM exactly once.
        grid = (grid_m, grid_n, grid_k)
        x_spec = pl.BlockSpec((tile_m, tile_k), lambda i, j, k: (i, k))
        wt_spec = pl.BlockSpec((tile_k, tile_n), lambda i, j, k: (k, j))
        b_spec = pl.BlockSpec((1, tile_n), lambda i, j, k: (0, j))
        beta_spec = pl.BlockSpec((1, tile_n), lambda i, j, k: (0, j))
        out_spec = pl.BlockSpec((tile_m, tile_n), lambda i, j, k: (i, j))
        col_axis = 1

    # Advisory cost that reflects the actual operand re-fetch of this ordering.
    x_reads = grid_n if (grid_k > 1 or weight_outer) else 1
    wt_reads = 1 if (grid_k == 1 and weight_outer) else grid_m
    cost = pl.CostEstimate(
        flops=2 * n * inp_dim * (outp_dim + 1),
        transcendentals=0,
        bytes_accessed=(x_reads * n * inp_dim * 4
                        + wt_reads * k_pad * out_cols * 4
                        + n * (outp_dim + 1) * out_bytes),
    )

    kernel = functools.partial(
        _random_context_kernel,
        grid_k=grid_k, tile_k=tile_k, tile_n=tile_n, inp_dim=inp_dim,
        ones_col=outp_dim, col_axis=col_axis,
        mask_k_tail=(inp_dim % tile_k != 0),
    )
    scratch = [pltpu.VMEM((tile_m, tile_n), jnp.float32)] if grid_k > 1 else []

    return pl.pallas_call(
        kernel,
        out_shape=jax.ShapeDtypeStruct((n, outp_dim + 1), out_dtype),
        grid_spec=pltpu.PrefetchScalarGridSpec(
            num_scalar_prefetch=0,
            grid=grid,
            in_specs=[x_spec, wt_spec, b_spec, beta_spec],
            out_specs=out_spec,
            scratch_shapes=scratch,
        ),
        compiler_params=pltpu.CompilerParams(
            dimension_semantics=("parallel", "parallel", "arbitrary"),
            vmem_limit_bytes=_VMEM_LIMIT_BYTES,
        ),
        cost_estimate=cost,
    )(x, wt_pad, b_pad, beta_pad)


# ---------------------------------------------------------------------------
# Deterministic init mirroring the module's __init__ shapes
# ---------------------------------------------------------------------------
def _init_params(inp_dim, outp_dim, key):
    """weight: orthogonal rows; bias: Linear default U(-1/sqrt(in), 1/sqrt(in));
    beta: zeros."""
    kw, kb = jax.random.split(key)
    a = jax.random.normal(kw, (inp_dim, outp_dim), dtype=jnp.float32)
    q, r = jnp.linalg.qr(a)
    q = q * jnp.sign(jnp.diagonal(r))[None, :]
    w = q.T                                            # [outp_dim, inp_dim]
    bound = 1.0 / jnp.sqrt(jnp.float32(inp_dim))
    b = jax.random.uniform(kb, (outp_dim,), dtype=jnp.float32,
                           minval=-bound, maxval=bound)
    beta = jnp.zeros((outp_dim,), dtype=jnp.float32)
    return w, b, beta


# TODO(synk): quantile_init_beta (stateful median init of beta) is a training-time
# state update, not part of forward; it is intentionally not implemented here.

if __name__ == "__main__":
    key = jax.random.PRNGKey(0)
    k_x, k_p, k_x2 = jax.random.split(key, 3)

    N, INP_DIM, OUTP_DIM = 8, 32, 16
    x = jax.random.normal(k_x, (N, INP_DIM), dtype=jnp.float32)
    w, b, beta = _init_params(INP_DIM, OUTP_DIM, k_p)

    params = prepare_random_context_params(w, b, beta)      # one-time packing

    # Case 1: tiny batch (single tile, masked lane tail on the output).
    out = jax.block_until_ready(random_context_forward(x, params))
    y_ref = jnp.dot(x, w.T, precision=jax.lax.Precision.HIGHEST) + b[None, :]
    ref_gate = (y_ref >= beta[None, :]).astype(jnp.float32)
    ref = jnp.concatenate([ref_gate, jnp.ones((N, 1), jnp.float32)], axis=1)
    assert out.shape == (N, OUTP_DIM + 1)
    assert out.dtype == jnp.float32
    assert bool(jnp.all(out == ref))

    # Case 2: mid-size batch -> 2-way row split (megacore) + masked tail rows.
    N2 = 100
    x2 = jax.random.normal(k_x2, (N2, INP_DIM), dtype=jnp.float32)
    out2 = jax.block_until_ready(random_context_forward(x2, params))
    y_ref2 = jnp.dot(x2, w.T, precision=jax.lax.Precision.HIGHEST) + b[None, :]
    ref_gate2 = (y_ref2 >= beta[None, :]).astype(jnp.float32)
    ref2 = jnp.concatenate([ref_gate2, jnp.ones((N2, 1), jnp.float32)], axis=1)
    assert out2.shape == (N2, OUTP_DIM + 1)
    assert bool(jnp.all(out2 == ref2))

    print("KERNEL_OK")
</pallas_src>

<mosaic_0001>
module attributes {stable_mosaic.version = 11 : i64} {
  func.func @_random_context_kernel(%arg0: i32, %arg1: i32, %arg2: i32, %arg3: memref<8x32xf32, #tpu.memory_space<vmem>>, %arg4: memref<32x128xf32, #tpu.memory_space<vmem>>, %arg5: memref<1x128xf32, #tpu.memory_space<vmem>>, %arg6: memref<1x128xf32, #tpu.memory_space<vmem>>, %arg7: memref<8x128xf32, #tpu.memory_space<vmem>>) attributes {dimension_semantics = [#tpu.dimension_semantics<parallel>, #tpu.dimension_semantics<parallel>, #tpu.dimension_semantics<arbitrary>], iteration_bounds = array<i64: 1, 1, 1>, scalar_prefetch = 0 : i64, scratch_operands = 0 : i64, tpu.core_type = #tpu.core_type<tc>, window_params = [{transform_indices = @transform_0, window_bounds = array<i64: 8, 32>}, {transform_indices = @transform_1, window_bounds = array<i64: 32, 128>}, {transform_indices = @transform_2, window_bounds = array<i64: 1, 128>}, {transform_indices = @transform_3, window_bounds = array<i64: 1, 128>}, {transform_indices = @transform_4, window_bounds = array<i64: 8, 128>}]} {
    %c0 = arith.constant 0 : index
    %c0_0 = arith.constant 0 : index
    %0 = vector.load %arg3[%c0, %c0_0] : memref<8x32xf32, #tpu.memory_space<vmem>>, vector<8x32xf32>
    %c0_1 = arith.constant 0 : index
    %c0_2 = arith.constant 0 : index
    %1 = vector.load %arg4[%c0_1, %c0_2] : memref<32x128xf32, #tpu.memory_space<vmem>>, vector<32x128xf32>
    %cst = arith.constant dense<0.000000e+00> : vector<8x128xf32>
    %2 = tpu.matmul %0, %1, %cst {dimension_numbers = #tpu.dot_dimension_numbers<[1], [0], [0], [1], [0, 0, 1, 1], [], []>} : vector<8x32xf32>, vector<32x128xf32>, vector<8x128xf32> -> vector<8x128xf32>
    %c0_3 = arith.constant 0 : index
    %c0_4 = arith.constant 0 : index
    %3 = vector.load %arg5[%c0_3, %c0_4] : memref<1x128xf32, #tpu.memory_space<vmem>>, vector<1x128xf32>
    %4 = vector.broadcast %3 : vector<1x128xf32> to vector<8x128xf32>
    %5 = arith.addf %2, %4 : vector<8x128xf32>
    %c0_5 = arith.constant 0 : index
    %c0_6 = arith.constant 0 : index
    %6 = vector.load %arg6[%c0_5, %c0_6] : memref<1x128xf32, #tpu.memory_space<vmem>>, vector<1x128xf32>
    %7 = vector.broadcast %6 : vector<1x128xf32> to vector<8x128xf32>
    %8 = arith.cmpf oge, %5, %7 : vector<8x128xf32>
    %9 = tpu.iota {dimensions = array<i32: 1>} : vector<8x128xi32>
    %c128_i32 = arith.constant 128 : i32
    %10 = arith.muli %arg0, %c128_i32 : i32
    %11 = vector.broadcast %10 : i32 to vector<8x128xi32>
    %12 = arith.addi %9, %11 : vector<8x128xi32>
    %c16_i32 = arith.constant 16 : i32
    %13 = vector.broadcast %c16_i32 : i32 to vector<8x128xi32>
    %14 = arith.cmpi eq, %12, %13 : vector<8x128xi32>
    %15 = arith.ori %8, %14 : vector<8x128xi1>
    %16 = arith.extui %15 : vector<8x128xi1> to vector<8x128xi32>
    %17 = arith.sitofp %16 : vector<8x128xi32> to vector<8x128xf32>
    %c0_7 = arith.constant 0 : index
    %c0_8 = arith.constant 0 : index
    %18 = vector.load %arg7[%c0_7, %c0_8] : memref<8x128xf32, #tpu.memory_space<vmem>>, vector<8x128xf32>
    tpu.vector_store %arg7[%c0_7, %c0_8], %17 {strides = array<i32>} : memref<8x128xf32, #tpu.memory_space<vmem>>, vector<8x128xf32>,
    return
  }
  func.func @transform_0(%arg0: i32, %arg1: i32, %arg2: i32) -> (i32, i32) {
    %c0_i32 = arith.constant 0 : i32
    return %arg1, %arg2 : i32, i32
  }
  func.func @transform_1(%arg0: i32, %arg1: i32, %arg2: i32) -> (i32, i32) {
    %c0_i32 = arith.constant 0 : i32
    return %arg2, %arg0 : i32, i32
  }
  func.func @transform_2(%arg0: i32, %arg1: i32, %arg2: i32) -> (i32, i32) {
    %c0_i32 = arith.constant 0 : i32
    %c0_i32_0 = arith.constant 0 : i32
    return %c0_i32, %arg0 : i32, i32
  }
  func.func @transform_3(%arg0: i32, %arg1: i32, %arg2: i32) -> (i32, i32) {
    %c0_i32 = arith.constant 0 : i32
    %c0_i32_0 = arith.constant 0 : i32
    return %c0_i32, %arg0 : i32, i32
  }
  func.func @transform_4(%arg0: i32, %arg1: i32, %arg2: i32) -> (i32, i32) {
    %c0_i32 = arith.constant 0 : i32
    return %arg1, %arg0 : i32, i32
  }
}

</mosaic_0001>

<bundles_post_ra>
// kernel: tpu_custom_call.1
= control target key start
LH: loop header
LB: loop body
LE: loop exit
PB: predicated region body
PF: predicated region fallthrough
CT: control target
= control target key end

     0   :  { %9 = vsyncpa [#allocation3], 0  ;;  %s352_s0 = inlined_call_operand.hbm [shape: f32[8,32], index: 0, kind: input, shape index: {}]   ;;  %s353_s1 = inlined_call_operand.hbm [shape: f32[32,128], index: 1, kind: input, shape index: {}]   ;;  %s354_s2 = inlined_call_operand.vmem [shape: f32[1,128], index: 2, kind: input, shape index: {}]   ;;  %s355_s3 = inlined_call_operand.vmem [shape: f32[1,128], index: 3, kind: input, shape index: {}]   ;;  %s356_s4 = inlined_call_operand.hbm [shape: f32[8,17], index: 4, kind: output, shape index: {}]  }
   0x1   :  { %10 = vsyncpa [#allocation6], 0 }
   0x2   :  { %11 = vsyncpa [#allocation4], 0  ;;  %s270_s15 = smov [#allocation2]   ;;  %s271_s17 = smov [#allocation5]  }
   0x3   :  { %s18_s16 = sshll.u32 %s270_s15, 4  ;;  %s27_s18 = sshll.u32 %s271_s17, 4  ;;  %s19_s16 = int_to_ptr.vmem [resolvable:$true] %s18_s16  ;;  %s303_s18 = int_to_ptr.vmem [resolvable:$true] %s27_s18 }
   0x4   :  { %s198_s21 = scalar_lea.hbm %s352_s0, 128 }
   0x5   :  { %p199_p0 = scmp.ne.s32.totalorder %s352_s0, %s198_s21  ;;  %p202_p1 = scmp.lt.u32.totalorder %s198_s21, %s352_s0 }
   0x7   :  { %p204_p2 = pnand %p202_p1, %p199_p0 }
   0x9   :  { %207 = shalt.err (!%p204_p2)
}
   0xa   :  { %s208_s26 = scalar_lea.vmem %s19_s16, 128  ;;  %p213_p4 = scmp.lt.s32.totalorder %s19_s16, %s19_s16 }
   0xb   :  { %p209_p3 = scmp.ne.s32.totalorder %s19_s16, %s208_s26  ;;  %p214_p5 = scmp.lt.s32.totalorder %s208_s26, %s208_s26 }
   0xd   :  { %p215_p6 = por %p214_p5, %p213_p4 }
   0xf   :  { %p216_p7 = pnand %p215_p6, %p209_p3 }
  0x11   :  { %219 = shalt.err (!%p216_p7)
}
  0x12   :  { %21 = dma.hbm_to_vmem [thread:$0]  %s352_s0, 128, %s19_s16, [#allocation3]  }
  0x13   :  { %s220_s5 = scalar_lea.hbm %s353_s1, 512 }
  0x14   :  { %p221_p8 = scmp.ne.s32.totalorder %s353_s1, %s220_s5  ;;  %p224_p9 = scmp.lt.u32.totalorder %s220_s5, %s353_s1 }
  0x16   :  { %p226_p10 = pnand %p224_p9, %p221_p8 }
  0x18   :  { %229 = shalt.err (!%p226_p10)
}
  0x19   :  { %s230_s10 = scalar_lea.vmem %s303_s18, 512  ;;  %p235_p12 = scmp.lt.s32.totalorder %s303_s18, %s303_s18 }
  0x1a   :  { %p231_p11 = scmp.ne.s32.totalorder %s303_s18, %s230_s10  ;;  %p236_p13 = scmp.lt.s32.totalorder %s230_s10, %s230_s10 }
  0x1c   :  { %p237_p0 = por %p236_p13, %p235_p12 }
  0x1e   :  { %p238_p1 = pnand %p237_p0, %p231_p11 }
  0x20   :  { %241 = shalt.err (!%p238_p1)
}
  0x21   :  { %s272_s0 = smov 128   ;;  %s273_s11 = smov 8  }
  0x22   :  { %33 = dma.hbm_to_vmem [thread:$0]  %s353_s1, 512, %s303_s18, [#allocation6], %s272_s0, %s272_s0, %s273_s11  }
  0x23   :  { %264 = dma.done.wait [#allocation3], 128  }
  0x24   :  { %265 = vsyncadd [#allocation3], 4294967168 }
  0x25   :  { %266 = dma.done.wait [#allocation6], 512  }
  0x26   :  { %267 = vsyncadd [#allocation6], 4294966784  ;;  %v274_v0 = vmov 0.0|0.0   ;;  %vm275_vm0 = vmmov 0   ;;  %v276_v1 = vmov 0.0   ;;  %v45_v2 = vld [vmem:[#allocation5] sm:$0xff]  ;;  %v138_v9 = vlaneseq }
  0x27   :  { %184 = vmatprep.subr.bf16.mxu0 %v274_v0  ;;  %181 = vmatprep.mubr.msk.f32.mxu0 %vm275_vm0, %v276_v1  ;;  %v46_v3 = vld [vmem:[#allocation5 + $0x8] sm:$0xff]  ;;  %v47_v4 = vld [vmem:[#allocation5 + $0x10] sm:$0xff]  ;;  %v48_v6 = vld [vmem:[#allocation5 + $0x18] sm:$0xff]  ;;  %vm56_vm1 = vcmask 261120   ;;  %s277_s17 = smov [#allocation7]  }
  0x28   :  { %v185_v5 = vpack.c.bf16 %v46_v3, %v45_v2  ;;  %v188_v7 = vpack.c.bf16 %v48_v6, %v47_v4  ;;  %v44_v8 = vld [vmem:[#allocation2] sm:$0xff]  ;;  %v139_v10 = vand.u32 127, %v138_v9  ;;  %s154_s18 = sshll.u32 %s277_s17, 4  ;;  %s155_s18 = int_to_ptr.vmem [resolvable:$true] %s154_s18 }
  0x29   :  { %v164_v11 = vld [vmem:[%s354_s2] ss:$0 sm:$0xff]  ;;  %s242_s19 = scalar_lea.vmem %s155_s18, 128  ;;  %p247_p3 = scmp.lt.s32.totalorder %s155_s18, %s155_s18 }
  0x2a   :  { %186 = vmatpush3.bf16.msra.mxu0 %v185_v5  ;;  %v166_v13 = vld [vmem:[%s355_s3] ss:$0 sm:$0xff]  ;;  %vm143_vm2 = vcmp.eq.s32.totalorder %v139_v10, 16  ;;  %p243_p2 = scmp.ne.s32.totalorder %s155_s18, %s242_s19  ;;  %p248_p4 = scmp.lt.s32.totalorder %s242_s19, %s242_s19 }
  0x2b   :  { %187 = vmatprep.subr.bf16.mxu0 %v274_v0 }
  0x2c   :  { %p249_p5 = por %p248_p4, %p247_p3 }
  0x2e   :  { %189 = vmatpush3.bf16.msra.mxu0 %v188_v7  ;;  %p250_p6 = pnand %p249_p5, %p243_p2 }
  0x31   :  { %182 = vmatmul.mubr.msk.f32.vlgmr.msra.gmra.mrb[0].mxu0 %vm56_vm1, %v44_v8 }
 0x104   :  { %v126_v12 = vpop.f32.mrb[0].mxu0 }
 0x105   :  { %v127_v14 = vadd.f32 %v164_v11, %v126_v12  ;;  %v183_v15 = vpop.f32.mrb[1].mxu0 }
 0x107   :  { %vm137_vm3 = vcmp.ge.f32.partialorder %v127_v14, %v166_v13 }
 0x108   :  { %vm144_vm4 = vmor %vm137_vm3, %vm143_vm2 }
 0x109   :  { %v167_v16 = vsel %vm144_vm4, 1.0, %v276_v1 }
 0x10a   :  { %147 = vst [vmem:[#allocation7] sm:$0xff] %v167_v16 }
 0x10b   :  { %253 = shalt.err (!%p250_p6)
}
 0x10c   :  { %s254_s3 = scalar_lea.hbm %s356_s4, 128 }
 0x10d   :  { %p255_p7 = scmp.ne.s32.totalorder %s356_s4, %s254_s3  ;;  %p258_p8 = scmp.lt.u32.totalorder %s254_s3, %s356_s4 }
 0x10f   :  { %p260_p9 = pnand %p258_p8, %p255_p7 }
 0x111   :  { %263 = shalt.err (!%p260_p9)
}
 0x112   :  { %157 = dma.vmem_to_hbm [thread:$0]  %s155_s18, 128, %s356_s4, [#allocation4]  }
 0x113   :  { %268 = dma.done.wait [#allocation4], 128  }
 0x114   :  { %269 = vsyncadd [#allocation4], 4294967168 }
 0x115   :  { %161 = vsyncpa [#allocation3], 1 }
 0x116   :  { %162 = vsyncpa [#allocation6], 1 }
 0x117   :  { %163 = vsyncpa [#allocation4], 1 }

</bundles_post_ra>
